<compile_context>
chip_gen: v6e
topology: v6e:2x2x1
jax: 0.10.0
libtpu: 0.0.40
codegen_flags: <defaults>
</compile_context>

<pallas_src>
import functools

import jax
import jax.numpy as jnp
import numpy as np
from jax import lax
from jax.experimental import pallas as pl
from jax.experimental.pallas import tpu as pltpu


def _round_up(x, m):
    return ((x + m - 1) // m) * m


# ----------------------------- Pallas kernel ---------------------------------
def _resblock_kernel(x_ref, w1_ref, t1_ref, w2_ref, t2_ref, o_ref,
                     x_prev_ref, h_prev_ref, *, T, J, L_valid, mm_dtype, precision):
    """Grid step (n, j), j in [0, J].

    Step j computes h = relu(bn1(conv1(x))) for the lane window
    [j*T - 1, (j+1)*T - 1) (tile shifted left by one column) and, using the h
    tile carried from step j-1 plus the first two columns of the current h
    tile (the right halo), emits output tile j-1 = relu(bn2(conv2(h)) + x_{j-1}).
    Step j == J only flushes the last output tile.
    """
    j = pl.program_id(1)
    f32 = jnp.float32

    x_cur = x_ref[...]                        # (C, T) f32, input tile min(j, J-1)
    x_prev = x_prev_ref[...]                  # (C, T) f32, tile j-1 (garbage at j==0)
    lane = lax.broadcasted_iota(jnp.int32, x_cur.shape, 1)

    w1 = w1_ref[...]                          # (C, 3C) mm_dtype, bias+BN folded in
    t1 = t1_ref[...]                          # (C, 1)  f32, folded shift

    # ---- conv1 + bn1 + relu over window columns g = j*T - 1 + c -------------
    # taps: tap_m1[:,c]=x(g-1), tap_0[:,c]=x(g), tap_p1[:,c]=x(g+1).
    # Left halo (2 columns) comes from the carried previous x tile; the
    # "current" tile is all-zero on the flush step j == J.
    x_eff = jnp.where(j < J, x_cur, 0.0)
    xl_m2 = jnp.where(j > 0, x_prev[:, T - 2:T - 1], 0.0)    # x(j*T - 2)
    xl_m1 = jnp.where(j > 0, x_prev[:, T - 1:T], 0.0)        # x(j*T - 1)
    tap_p1 = x_eff
    tap_0 = jnp.where(lane == 0, xl_m1, pltpu.roll(x_eff, shift=1, axis=1))
    tap_m1 = jnp.where(lane == 0, xl_m2,
                       jnp.where(lane == 1, xl_m1,
                                 pltpu.roll(x_eff, shift=2, axis=1)))
    x3 = jnp.concatenate([tap_m1, tap_0, tap_p1], axis=0)    # (3C, T)
    h = jnp.dot(w1, x3.astype(mm_dtype),
                preferred_element_type=f32, precision=precision) + t1
    h = jnp.maximum(h, 0.0)
    # Zero h outside the valid sequence so conv2 sees true zero padding at both
    # sequence ends and the L -> L_pad lane padding never leaks into the result.
    gcol = lane + (j * T - 1)
    h = jnp.where((gcol >= 0) & (gcol < L_valid), h, 0.0)

    # ---- conv2 + bn2 + residual + relu for output tile j-1 ------------------
    @pl.when(j >= 1)
    def _():
        h_prev = h_prev_ref[...]              # h window of tile j-1, (C, T)
        w2 = w2_ref[...]
        t2 = t2_ref[...]
        # Output column c (global G = (j-1)*T + c) taps h(G-1), h(G), h(G+1).
        tap2_m1 = h_prev
        tap2_0 = jnp.where(lane == T - 1, h[:, 0:1],
                           pltpu.roll(h_prev, shift=T - 1, axis=1))
        tap2_p1 = jnp.where(lane == T - 2, h[:, 0:1],
                            jnp.where(lane == T - 1, h[:, 1:2],
                                      pltpu.roll(h_prev, shift=T - 2, axis=1)))
        h3 = jnp.concatenate([tap2_m1, tap2_0, tap2_p1], axis=0)   # (3C, T)
        y = jnp.dot(w2, h3.astype(mm_dtype),
                    preferred_element_type=f32, precision=precision) + t2
        o_ref[...] = jnp.maximum(y + x_prev, 0.0)

    # ---- carry x / h tiles to the next step ----------------------------------
    @pl.when(j < J)
    def _():
        x_prev_ref[...] = x_cur
        h_prev_ref[...] = h


# -------------------------- parameter folding --------------------------------
def fold_conv_bn(w, b, gamma, beta, mean, var, c_pad, mm_dtype, eps=1e-5):
    """Fold Conv1d bias + eval-mode BatchNorm1d into the conv weights.

      bn(conv(x)) = s*(W*x + b) + (beta - mean*s),  s = gamma / sqrt(var + eps)
                  = (s*W)*x + (s*(b - mean) + beta)

    Returns tap-stacked weights (C_pad, 3*C_pad) matching the in-kernel tap
    order [x_{l-1}; x_l; x_{l+1}] and the folded per-channel shift (C_pad, 1).
    """
    c = w.shape[0]
    s = gamma / jnp.sqrt(var + eps)
    shift = s * (b - mean) + beta
    wf = w * s[:, None, None]                                    # (C, C, 3)
    wp = jnp.zeros((c_pad, c_pad, 3), jnp.float32).at[:c, :c, :].set(wf)
    w_stk = jnp.concatenate([wp[:, :, 0], wp[:, :, 1], wp[:, :, 2]], axis=1)
    shift_p = jnp.zeros((c_pad,), jnp.float32).at[:c].set(shift)
    return w_stk.astype(mm_dtype), shift_p.reshape(c_pad, 1)


# ------------------------------- wrapper --------------------------------------
def residual_block(x, raw_params, *, l_tile=512, use_bf16=False):
    """x: (N, C, L) float32.  raw_params: PyTorch-layout conv/BN params."""
    N, C, L = x.shape
    c_pad = _round_up(max(C, 8), 8)                       # sublane-friendly channels
    t = _round_up(min(l_tile, _round_up(L, 128)), 128)    # lane tile, multiple of 128
    l_pad = _round_up(L, t)
    n_tiles = l_pad // t

    mm_dtype = jnp.bfloat16 if use_bf16 else jnp.float32
    precision = None if use_bf16 else lax.Precision.HIGHEST

    # Bias + BN folding is plain XLA, done once per parameter set in real use.
    w1, t1 = fold_conv_bn(raw_params["w1"], raw_params["b1"], raw_params["g1"],
                          raw_params["be1"], raw_params["m1"], raw_params["v1"],
                          c_pad, mm_dtype)
    w2, t2 = fold_conv_bn(raw_params["w2"], raw_params["b2"], raw_params["g2"],
                          raw_params["be2"], raw_params["m2"], raw_params["v2"],
                          c_pad, mm_dtype)

    x_p = jnp.pad(x.astype(jnp.float32),
                  ((0, 0), (0, c_pad - C), (0, l_pad - L)))

    kernel = functools.partial(_resblock_kernel, T=t, J=n_tiles, L_valid=L,
                               mm_dtype=mm_dtype, precision=precision)

    # Raise scoped VMEM only when the tile plan actually needs it
    # (keep <= 64 MiB so the plan also fits v7x; shrink l_tile for bigger shapes).
    act_tile = c_pad * t * 4
    w_bytes = c_pad * 3 * c_pad * (2 if use_bf16 else 4)
    need = 8 * act_tile + 6 * w_bytes + (2 << 20)
    vmem_limit = int(min(need, 64 << 20)) if need > (16 << 20) else None

    const2 = lambda n, j: (0, 0)
    out = pl.pallas_call(
        kernel,
        out_shape=jax.ShapeDtypeStruct((N, c_pad, l_pad), jnp.float32),
        grid_spec=pltpu.PrefetchScalarGridSpec(
            num_scalar_prefetch=0,
            grid=(N, n_tiles + 1),                 # +1 step flushes the last L tile
            in_specs=[
                pl.BlockSpec((pl.Squeezed(), c_pad, t),
                             lambda n, j: (n, 0, jnp.minimum(j, n_tiles - 1))),
                pl.BlockSpec((c_pad, 3 * c_pad), const2),   # w1 (tap-stacked, folded)
                pl.BlockSpec((c_pad, 1), const2),           # folded shift 1
                pl.BlockSpec((c_pad, 3 * c_pad), const2),   # w2
                pl.BlockSpec((c_pad, 1), const2),           # folded shift 2
            ],
            out_specs=pl.BlockSpec((pl.Squeezed(), c_pad, t),
                                   lambda n, j: (n, 0, jnp.maximum(j - 1, 0))),
            scratch_shapes=[pltpu.VMEM((c_pad, t), jnp.float32),   # x tile carry
                            pltpu.VMEM((c_pad, t), jnp.float32)],  # h tile carry
        ),
        compiler_params=pltpu.CompilerParams(
            dimension_semantics=("parallel", "arbitrary"),
            vmem_limit_bytes=vmem_limit),
    )(x_p, w1, t1, w2, t2)
    return out[:, :C, :L]


# --------------------------- parameter setup ----------------------------------
def make_params(key, C):
    ks = jax.random.split(key, 12)
    conv_w = lambda k: jax.random.normal(k, (C, C, 3), jnp.float32) * 0.2
    vec = lambda k, s: s * jax.random.normal(k, (C,), jnp.float32)
    return dict(
        w1=conv_w(ks[0]), b1=vec(ks[1], 0.1),
        g1=1.0 + vec(ks[2], 0.1), be1=vec(ks[3], 0.1), m1=vec(ks[4], 0.1),
        v1=0.5 + 0.2 * jnp.abs(jax.random.normal(ks[5], (C,), jnp.float32)),
        w2=conv_w(ks[6]), b2=vec(ks[7], 0.1),
        g2=1.0 + vec(ks[8], 0.1), be2=vec(ks[9], 0.1), m2=vec(ks[10], 0.1),
        v2=0.5 + 0.2 * jnp.abs(jax.random.normal(ks[11], (C,), jnp.float32)),
    )


# ---------------------------- pure-JAX reference -------------------------------
def reference_forward(x, p, eps=1e-5):
    def conv1d(h, w, b):
        y = lax.conv_general_dilated(h, w, window_strides=(1,), padding=((1, 1),),
                                     dimension_numbers=("NCH", "OIH", "NCH"),
                                     precision=lax.Precision.HIGHEST)
        return y + b[None, :, None]

    def bn(h, g, beta, mean, var):
        s = g / jnp.sqrt(var + eps)
        return h * s[None, :, None] + (beta - mean * s)[None, :, None]

    h = jax.nn.relu(bn(conv1d(x, p["w1"], p["b1"]), p["g1"], p["be1"], p["m1"], p["v1"]))
    h = bn(conv1d(h, p["w2"], p["b2"]), p["g2"], p["be2"], p["m2"], p["v2"])
    return jax.nn.relu(h + x)


if __name__ == "__main__":
    key = jax.random.PRNGKey(0)
    cases = [
        # (N, C, L), l_tile, use_bf16, rtol, atol
        ((2, 4, 16), 512, False, 1e-5, 1e-5),    # canonical small shape
        ((2, 5, 300), 128, False, 1e-5, 1e-5),   # C padding + 3 L-tiles (halo carry)
        ((2, 16, 300), 128, True, 1e-1, 1e-1),   # bf16 MXU path (loose tolerance)
    ]
    for (shape, l_tile, use_bf16, rtol, atol) in cases:
        kx, kp, key = jax.random.split(key, 3)
        N, C, L = shape
        x = jax.random.normal(kx, (N, C, L), jnp.float32)
        raw = make_params(kp, C)
        out = jax.block_until_ready(
            residual_block(x, raw, l_tile=l_tile, use_bf16=use_bf16))
        ref = reference_forward(x, raw)
        np.testing.assert_allclose(np.asarray(out), np.asarray(ref),
                                   rtol=rtol, atol=atol)
    print("KERNEL_OK")
</pallas_src>

<mosaic_0001>
module attributes {stable_mosaic.version = 11 : i64} {
  func.func @_resblock_kernel(%arg0: i32, %arg1: i32, %arg2: memref<1x8x128xf32, #tpu.memory_space<vmem>>, %arg3: memref<8x24xf32, #tpu.memory_space<vmem>>, %arg4: memref<8x1xf32, #tpu.memory_space<vmem>>, %arg5: memref<8x24xf32, #tpu.memory_space<vmem>>, %arg6: memref<8x1xf32, #tpu.memory_space<vmem>>, %arg7: memref<1x8x128xf32, #tpu.memory_space<vmem>>, %arg8: memref<8x128xf32, #tpu.memory_space<vmem>>, %arg9: memref<8x128xf32, #tpu.memory_space<vmem>>) attributes {dimension_semantics = [#tpu.dimension_semantics<parallel>, #tpu.dimension_semantics<arbitrary>], iteration_bounds = array<i64: 2, 2>, scalar_prefetch = 0 : i64, scratch_operands = 2 : i64, tpu.core_type = #tpu.core_type<tc>, window_params = [{transform_indices = @transform_0, window_bounds = array<i64: 1, 8, 128>}, {pipeline_mode = #tpu.pipeline_mode<synchronous>, transform_indices = @transform_1, window_bounds = array<i64: 8, 24>}, {pipeline_mode = #tpu.pipeline_mode<synchronous>, transform_indices = @transform_2, window_bounds = array<i64: 8, 1>}, {pipeline_mode = #tpu.pipeline_mode<synchronous>, transform_indices = @transform_3, window_bounds = array<i64: 8, 24>}, {pipeline_mode = #tpu.pipeline_mode<synchronous>, transform_indices = @transform_4, window_bounds = array<i64: 8, 1>}, {transform_indices = @transform_5, window_bounds = array<i64: 1, 8, 128>}]} {
    %c0 = arith.constant 0 : index
    %c0_0 = arith.constant 0 : index
    %c0_1 = arith.constant 0 : index
    %0 = vector.load %arg2[%c0, %c0_0, %c0_1] : memref<1x8x128xf32, #tpu.memory_space<vmem>>, vector<1x8x128xf32>
    %1 = vector.shape_cast %0 : vector<1x8x128xf32> to vector<8x128xf32>
    %c0_2 = arith.constant 0 : index
    %c0_3 = arith.constant 0 : index
    %2 = vector.load %arg8[%c0_2, %c0_3] : memref<8x128xf32, #tpu.memory_space<vmem>>, vector<8x128xf32>
    %3 = tpu.iota {dimensions = array<i32: 1>} : vector<8x128xi32>
    %c0_4 = arith.constant 0 : index
    %c0_5 = arith.constant 0 : index
    %4 = vector.load %arg3[%c0_4, %c0_5] : memref<8x24xf32, #tpu.memory_space<vmem>>, vector<8x24xf32>
    %c0_6 = arith.constant 0 : index
    %c0_7 = arith.constant 0 : index
    %5 = vector.load %arg4[%c0_6, %c0_7] : memref<8x1xf32, #tpu.memory_space<vmem>>, vector<8x1xf32>
    %c1_i32 = arith.constant 1 : i32
    %6 = arith.cmpi slt, %arg1, %c1_i32 : i32
    %cst = arith.constant 0.000000e+00 : f32
    %7 = vector.broadcast %cst : f32 to vector<8x128xf32>
    %8 = arith.select %6, %1, %7 : vector<8x128xf32>
    %c0_i32 = arith.constant 0 : i32
    %9 = arith.cmpi sgt, %arg1, %c0_i32 : i32
    %10 = vector.extract_strided_slice %2 {offsets = [0, 126], sizes = [8, 1], strides = [1, 1]} : vector<8x128xf32> to vector<8x1xf32>
    %cst_8 = arith.constant 0.000000e+00 : f32
    %11 = vector.broadcast %cst_8 : f32 to vector<8x1xf32>
    %12 = arith.select %9, %10, %11 : vector<8x1xf32>
    %c0_i32_9 = arith.constant 0 : i32
    %13 = arith.cmpi sgt, %arg1, %c0_i32_9 : i32
    %14 = vector.extract_strided_slice %2 {offsets = [0, 127], sizes = [8, 1], strides = [1, 1]} : vector<8x128xf32> to vector<8x1xf32>
    %cst_10 = arith.constant 0.000000e+00 : f32
    %15 = vector.broadcast %cst_10 : f32 to vector<8x1xf32>
    %16 = arith.select %13, %14, %15 : vector<8x1xf32>
    %c0_i32_11 = arith.constant 0 : i32
    %17 = vector.broadcast %c0_i32_11 : i32 to vector<8x128xi32>
    %18 = arith.cmpi eq, %3, %17 : vector<8x128xi32>
    %c1_i32_12 = arith.constant 1 : i32
    %19 = tpu.dynamic_rotate %8 by %c1_i32_12 dim 1 : vector<8x128xf32>, i32 -> vector<8x128xf32>
    %20 = vector.shape_cast %16 : vector<8x1xf32> to vector<8x1xf32>
    %21 = vector.broadcast %20 : vector<8x1xf32> to vector<8x128xf32>
    %22 = arith.select %18, %21, %19 : vector<8x128xi1>, vector<8x128xf32>
    %c0_i32_13 = arith.constant 0 : i32
    %23 = vector.broadcast %c0_i32_13 : i32 to vector<8x128xi32>
    %24 = arith.cmpi eq, %3, %23 : vector<8x128xi32>
    %c1_i32_14 = arith.constant 1 : i32
    %25 = vector.broadcast %c1_i32_14 : i32 to vector<8x128xi32>
    %26 = arith.cmpi eq, %3, %25 : vector<8x128xi32>
    %c2_i32 = arith.constant 2 : i32
    %27 = tpu.dynamic_rotate %8 by %c2_i32 dim 1 : vector<8x128xf32>, i32 -> vector<8x128xf32>
    %28 = vector.shape_cast %16 : vector<8x1xf32> to vector<8x1xf32>
    %29 = vector.broadcast %28 : vector<8x1xf32> to vector<8x128xf32>
    %30 = arith.select %26, %29, %27 : vector<8x128xi1>, vector<8x128xf32>
    %31 = vector.shape_cast %12 : vector<8x1xf32> to vector<8x1xf32>
    %32 = vector.broadcast %31 : vector<8x1xf32> to vector<8x128xf32>
    %33 = arith.select %24, %32, %30 : vector<8x128xi1>, vector<8x128xf32>
    %34 = tpu.concatenate %33, %22, %8 in 0 : vector<8x128xf32>, vector<8x128xf32>, vector<8x128xf32> -> vector<24x128xf32>
    %cst_15 = arith.constant dense<0.000000e+00> : vector<8x128xf32>
    %35 = tpu.matmul %4, %34, %cst_15 {dimension_numbers = #tpu.dot_dimension_numbers<[1], [0], [0], [1], [0, 0, 1, 1], [], []>, precision = #tpu.contract_precision<fp32>} : vector<8x24xf32>, vector<24x128xf32>, vector<8x128xf32> -> vector<8x128xf32>
    %36 = vector.broadcast %5 : vector<8x1xf32> to vector<8x128xf32>
    %37 = arith.addf %35, %36 : vector<8x128xf32>
    %cst_16 = arith.constant 0.000000e+00 : f32
    %38 = vector.broadcast %cst_16 : f32 to vector<8x128xf32>
    %39 = arith.maximumf %37, %38 : vector<8x128xf32>
    %c128_i32 = arith.constant 128 : i32
    %40 = arith.muli %arg1, %c128_i32 : i32
    %c1_i32_17 = arith.constant 1 : i32
    %41 = arith.subi %40, %c1_i32_17 : i32
    %42 = vector.broadcast %41 : i32 to vector<8x128xi32>
    %43 = arith.addi %3, %42 : vector<8x128xi32>
    %c0_i32_18 = arith.constant 0 : i32
    %44 = vector.broadcast %c0_i32_18 : i32 to vector<8x128xi32>
    %45 = arith.cmpi sge, %43, %44 : vector<8x128xi32>
    %c16_i32 = arith.constant 16 : i32
    %46 = vector.broadcast %c16_i32 : i32 to vector<8x128xi32>
    %47 = arith.cmpi slt, %43, %46 : vector<8x128xi32>
    %48 = arith.andi %45, %47 : vector<8x128xi1>
    %cst_19 = arith.constant 0.000000e+00 : f32
    %49 = vector.broadcast %cst_19 : f32 to vector<8x128xf32>
    %50 = arith.select %48, %39, %49 : vector<8x128xi1>, vector<8x128xf32>
    %c1_i32_20 = arith.constant 1 : i32
    %51 = arith.cmpi sge, %arg1, %c1_i32_20 : i32
    %52 = arith.extui %51 : i1 to i32
    %c0_i32_21 = arith.constant 0 : i32
    %53 = arith.cmpi ne, %52, %c0_i32_21 : i32
    scf.if %53 {
      %c0_24 = arith.constant 0 : index
      %c0_25 = arith.constant 0 : index
      %57 = vector.load %arg9[%c0_24, %c0_25] : memref<8x128xf32, #tpu.memory_space<vmem>>, vector<8x128xf32>
      %c0_26 = arith.constant 0 : index
      %c0_27 = arith.constant 0 : index
      %58 = vector.load %arg5[%c0_26, %c0_27] : memref<8x24xf32, #tpu.memory_space<vmem>>, vector<8x24xf32>
      %c0_28 = arith.constant 0 : index
      %c0_29 = arith.constant 0 : index
      %59 = vector.load %arg6[%c0_28, %c0_29] : memref<8x1xf32, #tpu.memory_space<vmem>>, vector<8x1xf32>
      %c127_i32 = arith.constant 127 : i32
      %60 = vector.broadcast %c127_i32 : i32 to vector<8x128xi32>
      %61 = arith.cmpi eq, %3, %60 : vector<8x128xi32>
      %62 = vector.extract_strided_slice %50 {offsets = [0, 0], sizes = [8, 1], strides = [1, 1]} : vector<8x128xf32> to vector<8x1xf32>
      %c127_i32_30 = arith.constant 127 : i32
      %63 = tpu.dynamic_rotate %57 by %c127_i32_30 dim 1 : vector<8x128xf32>, i32 -> vector<8x128xf32>
      %64 = vector.shape_cast %62 : vector<8x1xf32> to vector<8x1xf32>
      %65 = vector.broadcast %64 : vector<8x1xf32> to vector<8x128xf32>
      %66 = arith.select %61, %65, %63 : vector<8x128xi1>, vector<8x128xf32>
      %c126_i32 = arith.constant 126 : i32
      %67 = vector.broadcast %c126_i32 : i32 to vector<8x128xi32>
      %68 = arith.cmpi eq, %3, %67 : vector<8x128xi32>
      %69 = vector.extract_strided_slice %50 {offsets = [0, 0], sizes = [8, 1], strides = [1, 1]} : vector<8x128xf32> to vector<8x1xf32>
      %c127_i32_31 = arith.constant 127 : i32
      %70 = vector.broadcast %c127_i32_31 : i32 to vector<8x128xi32>
      %71 = arith.cmpi eq, %3, %70 : vector<8x128xi32>
      %72 = vector.extract_strided_slice %50 {offsets = [0, 1], sizes = [8, 1], strides = [1, 1]} : vector<8x128xf32> to vector<8x1xf32>
      %c126_i32_32 = arith.constant 126 : i32
      %73 = tpu.dynamic_rotate %57 by %c126_i32_32 dim 1 : vector<8x128xf32>, i32 -> vector<8x128xf32>
      %74 = vector.shape_cast %72 : vector<8x1xf32> to vector<8x1xf32>
      %75 = vector.broadcast %74 : vector<8x1xf32> to vector<8x128xf32>
      %76 = arith.select %71, %75, %73 : vector<8x128xi1>, vector<8x128xf32>
      %77 = vector.shape_cast %69 : vector<8x1xf32> to vector<8x1xf32>
      %78 = vector.broadcast %77 : vector<8x1xf32> to vector<8x128xf32>
      %79 = arith.select %68, %78, %76 : vector<8x128xi1>, vector<8x128xf32>
      %80 = tpu.concatenate %57, %66, %79 in 0 : vector<8x128xf32>, vector<8x128xf32>, vector<8x128xf32> -> vector<24x128xf32>
      %cst_33 = arith.constant dense<0.000000e+00> : vector<8x128xf32>
      %81 = tpu.matmul %58, %80, %cst_33 {dimension_numbers = #tpu.dot_dimension_numbers<[1], [0], [0], [1], [0, 0, 1, 1], [], []>, precision = #tpu.contract_precision<fp32>} : vector<8x24xf32>, vector<24x128xf32>, vector<8x128xf32> -> vector<8x128xf32>
      %82 = vector.broadcast %59 : vector<8x1xf32> to vector<8x128xf32>
      %83 = arith.addf %81, %82 : vector<8x128xf32>
      %84 = arith.addf %83, %2 : vector<8x128xf32>
      %cst_34 = arith.constant 0.000000e+00 : f32
      %85 = vector.broadcast %cst_34 : f32 to vector<8x128xf32>
      %86 = arith.maximumf %84, %85 : vector<8x128xf32>
      %c0_35 = arith.constant 0 : index
      %c0_36 = arith.constant 0 : index
      %c0_37 = arith.constant 0 : index
      %87 = vector.load %arg7[%c0_35, %c0_36, %c0_37] : memref<1x8x128xf32, #tpu.memory_space<vmem>>, vector<1x8x128xf32>
      %88 = vector.shape_cast %87 : vector<1x8x128xf32> to vector<8x128xf32>
      %89 = vector.shape_cast %86 : vector<8x128xf32> to vector<1x8x128xf32>
      tpu.vector_store %arg7[%c0_35, %c0_36, %c0_37], %89 {strides = array<i32>} : memref<1x8x128xf32, #tpu.memory_space<vmem>>, vector<1x8x128xf32>,
    } else {
    }
    %c1_i32_22 = arith.constant 1 : i32
    %54 = arith.cmpi slt, %arg1, %c1_i32_22 : i32
    %55 = arith.extui %54 : i1 to i32
    %c0_i32_23 = arith.constant 0 : i32
    %56 = arith.cmpi ne, %55, %c0_i32_23 : i32
    scf.if %56 {
      %c0_24 = arith.constant 0 : index
      %c0_25 = arith.constant 0 : index
      %57 = vector.load %arg8[%c0_24, %c0_25] : memref<8x128xf32, #tpu.memory_space<vmem>>, vector<8x128xf32>
      tpu.vector_store %arg8[%c0_24, %c0_25], %1 {strides = array<i32>} : memref<8x128xf32, #tpu.memory_space<vmem>>, vector<8x128xf32>,
      %c0_26 = arith.constant 0 : index
      %c0_27 = arith.constant 0 : index
      %58 = vector.load %arg9[%c0_26, %c0_27] : memref<8x128xf32, #tpu.memory_space<vmem>>, vector<8x128xf32>
      tpu.vector_store %arg9[%c0_26, %c0_27], %50 {strides = array<i32>} : memref<8x128xf32, #tpu.memory_space<vmem>>, vector<8x128xf32>,
    } else {
    }
    return
  }
  func.func @transform_0(%arg0: i32, %arg1: i32) -> (i32, i32, i32) {
    %c0_i32 = arith.constant 0 : i32
    %0 = arith.minsi %arg1, %c0_i32 : i32
    %c0_i32_0 = arith.constant 0 : i32
    %c0_i32_1 = arith.constant 0 : i32
    return %arg0, %c0_i32_0, %0 : i32, i32, i32
  }
  func.func @transform_1(%arg0: i32, %arg1: i32) -> (i32, i32) {
    %c0_i32 = arith.constant 0 : i32
    %c0_i32_0 = arith.constant 0 : i32
    %c0_i32_1 = arith.constant 0 : i32
    return %c0_i32, %c0_i32_0 : i32, i32
  }
  func.func @transform_2(%arg0: i32, %arg1: i32) -> (i32, i32) {
    %c0_i32 = arith.constant 0 : i32
    %c0_i32_0 = arith.constant 0 : i32
    %c0_i32_1 = arith.constant 0 : i32
    return %c0_i32, %c0_i32_0 : i32, i32
  }
  func.func @transform_3(%arg0: i32, %arg1: i32) -> (i32, i32) {
    %c0_i32 = arith.constant 0 : i32
    %c0_i32_0 = arith.constant 0 : i32
    %c0_i32_1 = arith.constant 0 : i32
    return %c0_i32, %c0_i32_0 : i32, i32
  }
  func.func @transform_4(%arg0: i32, %arg1: i32) -> (i32, i32) {
    %c0_i32 = arith.constant 0 : i32
    %c0_i32_0 = arith.constant 0 : i32
    %c0_i32_1 = arith.constant 0 : i32
    return %c0_i32, %c0_i32_0 : i32, i32
  }
  func.func @transform_5(%arg0: i32, %arg1: i32) -> (i32, i32, i32) {
    %c1_i32 = arith.constant 1 : i32
    %0 = arith.subi %arg1, %c1_i32 : i32
    %c0_i32 = arith.constant 0 : i32
    %1 = arith.maxsi %0, %c0_i32 : i32
    %c0_i32_0 = arith.constant 0 : i32
    %c0_i32_1 = arith.constant 0 : i32
    return %arg0, %c0_i32_0, %1 : i32, i32, i32
  }
}

</mosaic_0001>

<bundles_post_ra>
// kernel: tpu_custom_call.1
= control target key start
LH: loop header
LB: loop body
LE: loop exit
PB: predicated region body
PF: predicated region fallthrough
CT: control target
= control target key end

     0   :  { %s2235_s0 = inlined_call_operand.vmem [shape: f32[2,8,128], index: 0, kind: input, shape index: {}]   ;;  %s2236_s1 = inlined_call_operand.hbm [shape: f32[8,24], index: 1, kind: input, shape index: {}]   ;;  %s2237_s2 = inlined_call_operand.vmem [shape: f32[8,1], index: 2, kind: input, shape index: {}]   ;;  %s2238_s3 = inlined_call_operand.hbm [shape: f32[8,24], index: 3, kind: input, shape index: {}]   ;;  %s2239_s4 = inlined_call_operand.vmem [shape: f32[8,1], index: 4, kind: input, shape index: {}]   ;;  %s2240_s5 = inlined_call_operand.hbm [shape: f32[2,8,128], index: 5, kind: output, shape index: {}]  }
   0x1   :  { %2245 = sst [smem:[#allocation13_spill]] %s2235_s0 }
   0x2   :  { %10 = vsyncpa [#allocation5], 0 }
   0x3   :  { %11 = vsyncpa [#allocation8], 0 }
   0x4   :  { %12 = vsyncpa [#allocation6], 0 }
   0x5   :  { %14 = vsyncpa [#allocation6 + $0x1], 0  ;;  %s1938_s18 = smov 0   ;;  %s1940_s19 = smov 0  }
   0x6   :  { %s1942_s20 = smov 0   ;;  %s1944_s21 = smov 0  }
   0x7   :  { %s1946_s22 = smov 0   ;;  %s1948_s23 = smov 0  }
   0x8   :  { %s1950_s24 = smov 0   ;;  %s1952_s25 = smov 0  }
   0x9 LB: > { %s1445_s26 = sadd.s32 4294967295, %s1890_s25   ;;  %s1446_s27 = sadd.s32 4294967294, %s1890_s25   ;;  %s1890_s25 = sphi %s1952_s25, %s20_s25   ;;  %s1886_s24 = sphi %s1950_s24, %s2262_s24   ;;  %s1882_s23 = sphi %s1948_s23, %s2261_s23   ;;  %s1878_s22 = sphi %s1946_s22, %s2260_s22   ;;  %s1874_s21 = sphi %s1944_s21, %s2259_s21   ;;  %s1870_s20 = sphi %s1942_s20, %s2258_s20   ;;  %s1866_s19 = sphi %s1940_s19, %s2257_s19   ;;  %s1862_s18 = sphi %s1938_s18, %s2256_s18  }
   0xa   : > { %s29_s28 = sadd.s32 1, %s1882_s23  ;;  %s32_s29 = sadd.s32 1, %s1886_s24 }
   0xb   : > { %p30_p0 = scmp.ge.s32.totalorder %s29_s28, 2  ;;  %s163_s30 = sadd.s32 1, %s1870_s20 }
   0xc   : > { %p173_p2 = scmp.ne.s32.totalorder %s1870_s20, %s1866_s19  ;;  %p174_p3 = scmp.eq.s32.totalorder %s1445_s26, 3 }
   0xd   : > { %s2264_s28 = smov (%p30_p0, %s29_s28), 0  ;;  %s2266_s29 = smov (!%p30_p0, %s32_s29), %s1886_s24 }
   0xe   : > { %p34_p1 = scmp.ge.s32.totalorder %s2266_s29, 2  ;;  %p179_p4 = scmp.ne.s32.totalorder %s1866_s19, %s1862_s18 }
   0xf   : > { %p1994_p5 = por %p174_p3, %p173_p2  ;;  %p180_p7 = scmp.eq.s32.totalorder %s1446_s27, 3 }
  0x10   : > { %s2268_s29 = smov (%p34_p1, %s2266_s29), 0  ;;  %p1449_p8 = scmp.ge.s32.totalorder %s1890_s25, 1 }
  0x11   : > { %s158_s6 = ssub.s32 %s1886_s24, %s2268_s29  ;;  %p187_p9 = scmp.lt.s32.totalorder %s1890_s25, 5 }
  0x12   : > { %s2246_s7 = scalar_select %p1994_p5, 1, 0 }
  0x13   : > { %p161_p6 = scmp.eq.s32.totalorder %s158_s6, 0  ;;  %p2003_p10 = por %p180_p7, %p179_p4 }
  0x14   : > { %p2007_p11 = pnand %p1449_p8, %p187_p9  ;;  %p2011_p12 = scmp.eq.s32.totalorder %s1445_s26, 0 }
  0x15   : > { %s2001_s8 = scalar_select %p161_p6, %s1870_s20, %s163_s30  }
  0x16   : > { %s2247_s9 = scalar_select %p2003_p10, 1, 0 }
  0x17   : > { %s2248_s10 = scalar_select %p2007_p11, 1, 0 }
  0x18   : > { %s2249_s11 = scalar_select %p2011_p12, 1, 0 }
  0x19   : > { %p1636_p13 = pneg %p2007_p11  ;;  %s1892_s12 = smov [#allocation4]  }
  0x1a   : > { %s200_s13 = sshll.u32 %s1892_s12, 4  ;;  %s1893_s15 = smov [#allocation7]   ;;  %s201_s13 = int_to_ptr.vmem [resolvable:$true] %s200_s13 }
  0x1b   : > { %p2019_p0 = pnand %p2011_p12, %p1636_p13  ;;  %s214_s16 = sshll.u32 %s1893_s15, 4  ;;  %s215_s16 = int_to_ptr.vmem [resolvable:$true] %s214_s16 }
  0x1c   : > { %s1749_s17 = scalar_lea.vmem %s201_s13, 128  ;;  %p1757_p6 = scmp.lt.s32.totalorder %s201_s13, %s201_s13 }
  0x1d   : > { %p1740_p1 = pneg %p2019_p0  ;;  %p1750_p2 = scmp.ne.s32.totalorder %s201_s13, %s1749_s17 }
  0x1e   : > { %p1758_p7 = scmp.lt.s32.totalorder %s1749_s17, %s1749_s17 }
  0x1f   : > { %p1752_p3 = pnand %p1750_p2, %p1740_p1 }
  0x20   : > { %p1759_p8 = por %p1758_p7, %p1757_p6 }
  0x21   : > { %p1753_p4 = pneg %p1752_p3 }
  0x23   : > { %p1760_p9 = pnand %p1759_p8, %p1753_p4 }
  0x25   : > { %1763 = shalt.err (!%p1760_p9)
}
  0x26   : > { %1639 = dma.hbm_to_vmem [thread:$0]  (!%p2019_p0), %s2236_s1, 128, %s201_s13, [#allocation5]  }
  0x27   : > { %s1775_s30 = scalar_lea.vmem %s215_s16, 128  ;;  %p1783_p2 = scmp.lt.s32.totalorder %s215_s16, %s215_s16 }
  0x28   : > { %p1776_p13 = scmp.ne.s32.totalorder %s215_s16, %s1775_s30  ;;  %p1784_p3 = scmp.lt.s32.totalorder %s1775_s30, %s1775_s30 }
  0x2a   : > { %p1778_p10 = pnand %p1776_p13, %p1740_p1  ;;  %p1785_p12 = por %p1784_p3, %p1783_p2 }
  0x2c   : > { %p1779_p5 = pneg %p1778_p10 }
  0x2e   : > { %p1786_p11 = pnand %p1785_p12, %p1779_p5 }
  0x30   : > { %1789 = shalt.err (!%p1786_p11)
}
  0x31   : > { %1642 = dma.hbm_to_vmem [thread:$0]  (!%p2019_p0), %s2238_s3, 128, %s215_s16, [#allocation8]  }
  0x32   : > { %p2251_p4 = scmp.ne.s32.totalorder %s2248_s10, 0 }
  0x33   : > { %p2252_p6 = scmp.ne.s32.totalorder (!%p2251_p4), %s2249_s11, 0 }
  0x34   : > { %244 = sbr.rel (%p2251_p4) target bundleno = 812 (0x32c), region = 40 }
  0x39   : > { %1849 = dma.done.wait (%p2252_p6), [#allocation5], 128  }
  0x3a   : > { %1851 = vsyncadd (%p2252_p6), [#allocation5], 4294967168 }
  0x3b   : > { %1853 = dma.done.wait (%p2252_p6), [#allocation8], 128  }
  0x3c   : > { %1855 = vsyncadd (%p2252_p6), [#allocation8], 4294967168  ;;  %p305_p5 = scmp.gt.s32.totalorder %s1874_s21, 0  ;;  %p280_p10 = scmp.lt.s32.totalorder %s1874_s21, 0  ;;  %v1894_v0 = vmov 127   ;;  %v1895_v2 = vmov 0.0   ;;  %v296_v18 = vlaneseq }
  0x3d   : > { %1731 = vset.pattern.permute.xlu0 %v1894_v0  ;;  %p282_p11 = scmp.lt.s32.totalorder %s1878_s22, 1  ;;  %p300_p12 = scmp.lt.s32.totalorder %s1874_s21, 1  ;;  %1518 = vmatprep.subr.mxu0 %v1895_v2  ;;  %v2061_v3 = vld [vmem:[#allocation2] sm:$0xff]  ;;  %v1897_v9 = vmov 126   ;;  %vm1898_vm2 = vmmov 0   ;;  %v1900_v15 = vmov 0  }
  0x3e   : > { %s306_s10 = scalar_select %p305_p5, 1, 0  ;;  %1527 = vmatprep.subr.mxu1 %v1895_v2  ;;  %1524 = vmatprep.mubr.msk.f32.mxu0 %vm1898_vm2, %v1895_v2  ;;  %v299_v14 = vld [vmem:[%s2237_s2] sm:$0xff]  ;;  %v298_v16 = vld [vmem:[#allocation4] sm:$0xff]  ;;  %vm333_vm3 = vcmask 195584   ;;  %v2091_v20 = vand.u32 127, %v296_v18 }
  0x3f   : > { %s281_s13 = scalar_select %p280_p10, %s1874_s21, 0  ;;  %1533 = vmatprep.mubr.msk.f32.mxu1 %vm1898_vm2, %v1895_v2  ;;  %1733 = vset.pattern.permute.xlu1 %v1900_v15  ;;  %v335_v17 = vsel %vm333_vm3, %v298_v16, 0 }
  0x40   : > { %v307_v1 = vstv %s306_s10  ;;  %s283_s14 = scalar_select %p282_p11, %s1878_s22, 1  ;;  %v2089_v19 = vand.u32 4294901760, %v335_v17  ;;  %vm310_vm4 = vcmp.eq.s32.totalorder %v2091_v20, 0  ;;  %vm319_vm5 = vcmp.eq.s32.totalorder %v2091_v20, 1 }
  0x41   : > { %vm308_vm0 = vcmp.eq.s32.totalorder %v307_v1, 1  ;;  %s2270_s13 = smov (!%p280_p10, %s281_s13), 0  ;;  %s2253_s0 = sld [smem:[#allocation13_spill]] }
  0x42   : > { %s301_s11 = scalar_select %p300_p12, 1, 0  ;;  %v309_v4 = vsel %vm308_vm0, %v2061_v3, 0.0  ;;  %v406_v21 = vsub.f32 %v335_v17, %v2089_v19 }
  0x43   : > { %s286_s15 = sadd.s32 %s2270_s13, %s283_s14  ;;  %315 = vperm.xlu0 %1731, %v309_v4   ;;  %s277_s30 = sand.u32 1, %s1866_s19  }
  0x44   : > { %s1460_s16 = sshll.u32 %s286_s15, 3  ;;  %v302_v5 = vstv %s301_s11  ;;  %s2072_s6 = sshll.u32 %s277_s30, 3  ;;  %v407_v23 = vand.u32 4294901760, %v406_v21 }
  0x45   : > { %vm303_vm1 = vcmp.eq.s32.totalorder %v302_v5, 1  ;;  %s1896_s12 = smov 1   ;;  %s1899_s10 = smov 2  }
  0x46   : > { %v408_v28 = vsub.f32 %v406_v21, %v407_v23  ;;  %s1461_s11 = sshll.u32 %s1874_s21, 7  ;;  %s1902_s17 = smov (!%p300_p12), 126  }
  0x47   : > { %s288_s27 = scalar_lea.vmem %s2253_s0, %s1460_s16  ;;  %1732 = vset.pattern.permute.xlu0 %v1897_v9  ;;  %s1462_s15 = sadd.s32 4294967295, %s1461_s11 }
  0x48   : > { %v2068_v6 = vld [vmem:[%s288_s27] sm:$0xff]  ;;  %324 = vperm.xlu0 %1732, %v309_v4   ;;  %v409_v33 = vand.u32 4294901760, %v408_v28  ;;  %v812_v52 = vstv %s1462_s15  ;;  %s279_s16 = scalar_lea.vmem [#allocation9], %s2072_s6  ;;  %s1904_s26 = smov (!%p300_p12), 127  }
  0x49   : > { %v304_v7 = vsel %vm303_vm1, %v2068_v6, 0.0  ;;  %v813_v55 = vadd.s32 %v812_v52, %v2091_v20 }
  0x4a   : > { %311 = vrot.lane.b32.xlu1 %v304_v7, %s1896_s12  ;;  %v2075_v8 = vand.u32 4294901760, %v304_v7 }
  0x4b   : > { %vm814_vm6 = vcmp.ge.s32.totalorder %v813_v55, 0  ;;  %vm815_vm7 = vcmp.lt.s32.totalorder %v813_v55, 16 }
  0x4c   : > { %1519 = vmatpush3.msra.mxu0 %v2075_v8  ;;  %v443_v10 = vsub.f32 %v304_v7, %v2075_v8  ;;  %1734 = vset.pattern.permute.xlu0 %v1900_v15  ;;  %vm816_vm8 = vmand %vm814_vm6, %vm815_vm7 }
  0x4d   : > { %1520 = vmatprep.subr.mxu0 %v1895_v2 }
  0x4e   : > { %320 = vrot.lane.b32.xlu1 %v304_v7, %s1899_s10  ;;  %v444_v11 = vand.u32 4294901760, %v443_v10 }
  0x50   : > { %v445_v12 = vsub.f32 %v443_v10, %v444_v11 }
  0x52   : > { %v446_v13 = vand.u32 4294901760, %v445_v12  ;;  %330 = vperm.xlu1 %1733, %v299_v14  }
  0x54   : > { %1528 = vmatpush3.msra.mxu1 %v446_v13 }
  0x55   : > { %1529 = vmatprep.subr.mxu1 %v1895_v2 }
  0xbc   : > { %v312_v22 = vpop.permute.xlu1 %311 }
  0xbe   : > { %v316_v24 = vpop.permute.xlu0 %315 }
  0xbf   : > { %v318_v25 = vsel %vm310_vm4, %v316_v24, %v312_v22 }
  0xc0   : > { %v367_v26 = vand.u32 4294901760, %v318_v25  ;;  %v321_v27 = vpop.permute.xlu1 %320 }
  0xc1   : > { %v322_v30 = vsel %vm319_vm5, %v316_v24, %v321_v27 }
  0xc2   : > { %v450_v29 = vsub.f32 %v318_v25, %v367_v26  ;;  %1521 = vmatpush3.msra.mxu0 %v367_v26 }
  0xc3   : > { %v325_v31 = vpop.permute.xlu0 %324  ;;  %1522 = vmatprep.subr.mxu0 %v1895_v2 }
  0xc4   : > { %v327_v32 = vsel %vm310_vm4, %v325_v31, %v322_v30  ;;  %v451_v34 = vand.u32 4294901760, %v450_v29 }
  0xc5   : > { %v370_v35 = vand.u32 4294901760, %v327_v32 }
  0xc6   : > { %v452_v36 = vsub.f32 %v450_v29, %v451_v34 }
  0xc7   : > { %v457_v37 = vsub.f32 %v327_v32, %v370_v35  ;;  %1523 = vmatpush3.msra.mxu0 %v370_v35 }
  0xc8   : > { %1536 = vmatprep.subr.mxu0 %v1895_v2  ;;  %1525 = vmatmul.mubr.f32.vlgmr.msra.gmra.mxu0 %v409_v33  ;;  %v453_v38 = vand.u32 4294901760, %v452_v36 }
  0xc9   : > { %1537 = vmatpush3.msra.mxu0 %v443_v10  ;;  %1542 = vmatprep.mubr.msk.f32.mxu0 %vm1898_vm2, %v1895_v2  ;;  %v458_v39 = vand.u32 4294901760, %v457_v37 }
  0xca   : > { %1530 = vmatpush3.msra.mxu1 %v453_v38  ;;  %1538 = vmatprep.subr.mxu0 %v1895_v2 }
  0xcb   : > { %1539 = vmatpush3.msra.mxu0 %v450_v29  ;;  %1531 = vmatprep.subr.mxu1 %v1895_v2  ;;  %v459_v40 = vsub.f32 %v457_v37, %v458_v39 }
  0xcc   : > { %1540 = vmatprep.subr.mxu0 %v1895_v2 }
  0xcd   : > { %1541 = vmatpush3.msra.mxu0 %v457_v37  ;;  %v460_v41 = vand.u32 4294901760, %v459_v40  ;;  %v331_v43 = vpop.permute.xlu1 %330 }
  0xce   : > { %1554 = vmatprep.subr.mxu0 %v1895_v2  ;;  %1543 = vmatmul.mubr.f32.vlgmr.msra.gmra.mxu0 %v406_v21 }
  0xcf   : > { %1532 = vmatpush3.msra.mxu1 %v460_v41  ;;  %1555 = vmatpush3.msra.mxu0 %v444_v11 }
  0xd0   : > { %1534 = vmatmul.mubr.f32.vlgmr.msra.gmra.mxu1 %v2089_v19  ;;  %1545 = vmatprep.subr.mxu1 %v1895_v2 }
  0xd1   : > { %1556 = vmatprep.subr.mxu0 %v1895_v2  ;;  %1546 = vmatpush3.msra.mxu1 %v2075_v8 }
  0xd2   : > { %1557 = vmatpush3.msra.mxu0 %v451_v34  ;;  %1547 = vmatprep.subr.mxu1 %v1895_v2 }
  0xd3   : > { %1558 = vmatprep.subr.mxu0 %v1895_v2  ;;  %1548 = vmatpush3.msra.mxu1 %v367_v26 }
  0xd4   : > { %1559 = vmatpush3.msra.mxu0 %v458_v39  ;;  %1549 = vmatprep.subr.mxu1 %v1895_v2 }
  0xd5   : > { %1550 = vmatpush3.msra.mxu1 %v370_v35  ;;  %1551 = vmatprep.mubr.msk.f32.mxu1 %vm1898_vm2, %v1895_v2 }
  0xd6   : > { %1552 = vmatmul.mubr.f32.vlgmr.msra.gmra.mxu1 %v407_v23  ;;  %1563 = vmatprep.subr.mxu1 %v1895_v2 }
  0xd7   : > { %1560 = vmatprep.mubr.msk.f32.mxu0 %vm1898_vm2, %v1895_v2  ;;  %1564 = vmatpush3.msra.mxu1 %v2075_v8 }
  0xd8   : > { %1561 = vmatmul.mubr.f32.vlgmr.msra.gmra.mxu0 %v2089_v19  ;;  %1565 = vmatprep.subr.mxu1 %v1895_v2 }
  0xd9   : > { %1566 = vmatpush3.msra.mxu1 %v367_v26  ;;  %1569 = vmatprep.mubr.msk.f32.mxu1 %vm1898_vm2, %v1895_v2 }
  0xda   : > { %1567 = vmatprep.subr.mxu1 %v1895_v2 }
  0xdb   : > { %1568 = vmatpush3.msra.mxu1 %v370_v35 }
  0xdc   : > { %1570 = vmatmul.mubr.f32.vlgmr.msra.gmra.mxu1 %v2089_v19 }
 0x188   : > { %v411_v42 = vpop.f32.mrf.mxu0 }
 0x189   : > { %v412_v45 = vadd.f32 %v411_v42, %v331_v43 }
 0x18a   : > { %v1526_v44 = vpop.f32.mrf.mxu0 }
 0x18e   : > { %v575_v46 = vpop.f32.mrf.mxu0 }
 0x190   : > { %v497_v47 = vpop.f32.mrf.mxu1  ;;  %v1544_v48 = vpop.f32.mrf.mxu0 }
 0x191   : > { %v498_v49 = vadd.f32 %v497_v47, %v412_v45 }
 0x192   : > { %v1535_v50 = vpop.f32.mrf.mxu1 }
 0x193   : > { %v576_v51 = vadd.f32 %v575_v46, %v498_v49 }
 0x196   : > { %v651_v53 = vpop.f32.mrf.mxu1 }
 0x197   : > { %v652_v54 = vadd.f32 %v651_v53, %v576_v51 }
 0x198   : > { %v1553_v56 = vpop.f32.mrf.mxu1  ;;  %v731_v57 = vpop.f32.mrf.mxu0 }
 0x199   : > { %v732_v59 = vadd.f32 %v731_v57, %v652_v54 }
 0x19a   : > { %v1562_v58 = vpop.f32.mrf.mxu0 }
 0x19c   : > { %v805_v60 = vpop.f32.mrf.mxu1 }
 0x19d   : > { %v806_v61 = vadd.f32 %v805_v60, %v732_v59  ;;  %821 = sbr.rel (%p300_p12) target bundleno = 778 (0x30a), region = 52 }
 0x19e   : > { %v1571_v62 = vpop.f32.mrf.mxu1 }
 0x19f   : > { %v809_v63 = vmax.f32 %v806_v61, 0.0 }
 0x1a1   : > { %v2125_v0 = vsel %vm816_vm8, %v809_v63, 0.0 }
 0x1a2   : > { %v822_v1 = vld [vmem:[#allocation3] sm:$0xff]  ;;  %v1901_v2 = vmov 1   ;;  %v1903_v4 = vmov 0   ;;  %v1905_v5 = vmov 0.0   ;;  %vm1906_vm9 = vmmov 0   ;;  %v824_v7 = vld [vmem:[%s2239_s4] sm:$0xff] }
 0x1a3   : > { %1735 = vset.pattern.permute.xlu0 %v1901_v2  ;;  %835 = vrot.lane.b32.xlu1 %v822_v1, %s1902_s17  ;;  %v823_v8 = vld [vmem:[#allocation7] sm:$0xff]  ;;  %v2145_v14 = vand.u32 4294901760, %v822_v1  ;;  %vm825_vm10 = vcmp.eq.s32.totalorder %v2091_v20, 127  ;;  %vm834_vm11 = vcmp.eq.s32.totalorder %v2091_v20, 126 }
 0x1a4   : > { %838 = vperm.xlu0 %1735, %v2125_v0   ;;  %1737 = vset.pattern.permute.xlu1 %v1903_v4  ;;  %v849_v9 = vsel %vm333_vm3, %v823_v8, 0 }
 0x1a5   : > { %1572 = vmatprep.subr.mxu0 %v1905_v5  ;;  %1581 = vmatprep.subr.mxu1 %v1905_v5  ;;  %v2142_v10 = vand.u32 4294901760, %v849_v9  ;;  %v971_v19 = vsub.f32 %v822_v1, %v2145_v14 }
 0x1a6   : > { %1578 = vmatprep.mubr.msk.f32.mxu0 %vm1906_vm9, %v1905_v5  ;;  %1587 = vmatprep.mubr.msk.f32.mxu1 %vm1906_vm9, %v1905_v5 }
 0x1a7   : > { %826 = vrot.lane.b32.xlu1 %v822_v1, %s1904_s26  ;;  %v920_v12 = vsub.f32 %v849_v9, %v2142_v10  ;;  %v972_v28 = vand.u32 4294901760, %v971_v19 }
 0x1a8   : > { %1736 = vset.pattern.permute.xlu0 %v1903_v4 }
 0x1a9   : > { %830 = vperm.xlu0 %1736, %v2125_v0   ;;  %v921_v15 = vand.u32 4294901760, %v920_v12  ;;  %v973_v33 = vsub.f32 %v971_v19, %v972_v28 }
 0x1ab   : > { %845 = vperm.xlu1 %1737, %v824_v7   ;;  %v922_v23 = vsub.f32 %v920_v12, %v921_v15  ;;  %v974_v36 = vand.u32 4294901760, %v973_v33 }
 0x1ad   : > { %v923_v29 = vand.u32 4294901760, %v922_v23 }
 0x215   : > { %v836_v11 = vpop.permute.xlu1 %835 }
 0x219   : > { %v827_v16 = vpop.permute.xlu1 %826 }
 0x21f   : > { %v839_v13 = vpop.permute.xlu0 %838 }
 0x220   : > { %v841_v17 = vsel %vm825_vm10, %v839_v13, %v836_v11 }
 0x224   : > { %v831_v18 = vpop.permute.xlu0 %830 }
 0x225   : > { %v842_v21 = vsel %vm834_vm11, %v831_v18, %v841_v17  ;;  %v833_v22 = vsel %vm825_vm10, %v831_v18, %v827_v16 }
 0x226   : > { %v878_v24 = vand.u32 4294901760, %v842_v21  ;;  %v881_v25 = vand.u32 4294901760, %v833_v22  ;;  %v846_v38 = vpop.permute.xlu1 %845 }
 0x228   : > { %v957_v26 = vsub.f32 %v842_v21, %v878_v24  ;;  %v964_v27 = vsub.f32 %v833_v22, %v881_v25  ;;  %1573 = vmatpush3.msra.mxu0 %v878_v24 }
 0x229   : > { %1574 = vmatprep.subr.mxu0 %v1905_v5 }
 0x22a   : > { %1575 = vmatpush3.msra.mxu0 %v881_v25  ;;  %v958_v30 = vand.u32 4294901760, %v957_v26  ;;  %v965_v20 = vand.u32 4294901760, %v964_v27 }
 0x22b   : > { %1576 = vmatprep.subr.mxu0 %v1905_v5 }
 0x22c   : > { %1577 = vmatpush3.msra.mxu0 %v2145_v14  ;;  %v959_v31 = vsub.f32 %v957_v26, %v958_v30  ;;  %v966_v32 = vsub.f32 %v964_v27, %v965_v20 }
 0x22d   : > { %1590 = vmatprep.subr.mxu0 %v1905_v5  ;;  %1579 = vmatmul.mubr.f32.vlgmr.msra.gmra.mxu0 %v923_v29 }
 0x22e   : > { %1591 = vmatpush3.msra.mxu0 %v957_v26  ;;  %v960_v34 = vand.u32 4294901760, %v959_v31  ;;  %1596 = vmatprep.mubr.msk.f32.mxu0 %vm1906_vm9, %v1905_v5  ;;  %v967_v35 = vand.u32 4294901760, %v966_v32 }
 0x22f   : > { %1592 = vmatprep.subr.mxu0 %v1905_v5 }
 0x230   : > { %1582 = vmatpush3.msra.mxu1 %v960_v34  ;;  %1593 = vmatpush3.msra.mxu0 %v964_v27 }
 0x231   : > { %1583 = vmatprep.subr.mxu1 %v1905_v5  ;;  %1594 = vmatprep.subr.mxu0 %v1905_v5 }
 0x232   : > { %1584 = vmatpush3.msra.mxu1 %v967_v35  ;;  %1595 = vmatpush3.msra.mxu0 %v971_v19 }
 0x233   : > { %1585 = vmatprep.subr.mxu1 %v1905_v5  ;;  %1608 = vmatprep.subr.mxu0 %v1905_v5 }
 0x234   : > { %1586 = vmatpush3.msra.mxu1 %v974_v36  ;;  %1597 = vmatmul.mubr.f32.vlgmr.msra.gmra.mxu0 %v920_v12 }
 0x235   : > { %1609 = vmatpush3.msra.mxu0 %v958_v30  ;;  %1588 = vmatmul.mubr.f32.vlgmr.msra.gmra.mxu1 %v2142_v10 }
 0x236   : > { %1599 = vmatprep.subr.mxu1 %v1905_v5  ;;  %1610 = vmatprep.subr.mxu0 %v1905_v5 }
 0x237   : > { %1600 = vmatpush3.msra.mxu1 %v878_v24  ;;  %1611 = vmatpush3.msra.mxu0 %v965_v20 }
 0x238   : > { %1601 = vmatprep.subr.mxu1 %v1905_v5  ;;  %1605 = vmatprep.mubr.msk.f32.mxu1 %vm1906_vm9, %v1905_v5 }
 0x239   : > { %1602 = vmatpush3.msra.mxu1 %v881_v25  ;;  %1612 = vmatprep.subr.mxu0 %v1905_v5 }
 0x23a   : > { %1603 = vmatprep.subr.mxu1 %v1905_v5  ;;  %1613 = vmatpush3.msra.mxu0 %v972_v28 }
 0x23b   : > { %1604 = vmatpush3.msra.mxu1 %v2145_v14  ;;  %1614 = vmatprep.mubr.msk.f32.mxu0 %vm1906_vm9, %v1905_v5 }
 0x23c   : > { %1606 = vmatmul.mubr.f32.vlgmr.msra.gmra.mxu1 %v921_v15  ;;  %1617 = vmatprep.subr.mxu1 %v1905_v5 }
 0x23d   : > { %1618 = vmatpush3.msra.mxu1 %v878_v24  ;;  %1615 = vmatmul.mubr.f32.vlgmr.msra.gmra.mxu0 %v2142_v10 }
 0x23e   : > { %1619 = vmatprep.subr.mxu1 %v1905_v5  ;;  %1623 = vmatprep.mubr.msk.f32.mxu1 %vm1906_vm9, %v1905_v5 }
 0x23f   : > { %1620 = vmatpush3.msra.mxu1 %v881_v25 }
 0x240   : > { %1621 = vmatprep.subr.mxu1 %v1905_v5 }
 0x241   : > { %1622 = vmatpush3.msra.mxu1 %v2145_v14 }
 0x242   : > { %1624 = vmatmul.mubr.f32.vlgmr.msra.gmra.mxu1 %v2142_v10 }
 0x2ed   : > { %v925_v37 = vpop.f32.mrf.mxu0 }
 0x2ee   : > { %v926_v40 = vadd.f32 %v925_v37, %v846_v38 }
 0x2ef   : > { %v1580_v39 = vpop.f32.mrf.mxu0 }
 0x2f4   : > { %v1089_v41 = vpop.f32.mrf.mxu0 }
 0x2f5   : > { %v1011_v42 = vpop.f32.mrf.mxu1 }
 0x2f6   : > { %v1012_v43 = vadd.f32 %v1011_v42, %v926_v40  ;;  %v1598_v44 = vpop.f32.mrf.mxu0 }
 0x2f7   : > { %v1589_v45 = vpop.f32.mrf.mxu1 }
 0x2f8   : > { %v1090_v46 = vadd.f32 %v1089_v41, %v1012_v43 }
 0x2fc   : > { %v1165_v47 = vpop.f32.mrf.mxu1 }
 0x2fd   : > { %v1166_v48 = vadd.f32 %v1165_v47, %v1090_v46  ;;  %v1245_v49 = vpop.f32.mrf.mxu0 }
 0x2fe   : > { %v1607_v50 = vpop.f32.mrf.mxu1 }
 0x2ff   : > { %v1616_v51 = vpop.f32.mrf.mxu0  ;;  %v1246_v52 = vadd.f32 %v1245_v49, %v1166_v48 }
 0x302   : > { %v1319_v53 = vpop.f32.mrf.mxu1 }
 0x303   : > { %v1320_v54 = vadd.f32 %v1319_v53, %v1246_v52 }
 0x304   : > { %v1625_v55 = vpop.f32.mrf.mxu1 }
 0x305   : > { %v1323_v56 = vadd.f32 %v1320_v54, %v2061_v3 }
 0x307   : > { %v1324_v57 = vmax.f32 %v1323_v56, 0.0 }
 0x309   : > { %1325 = vst [vmem:[%s279_s16] sm:$0xff] %v1324_v57 }
 0x30a PF: > { %p1464_p0 = scmp.ge.s32.totalorder %s1874_s21, 1 }
 0x30c   : > { %1328 = sbr.rel (%p1464_p0) target bundleno = 786 (0x312), region = 56 }
 0x311   : > { %1329 = vst [vmem:[#allocation2] sm:$0xff] %v2068_v6  ;;  %1330 = vst [vmem:[#allocation3] sm:$0xff] %v2125_v0 }
 0x312 PF: > { %s1466_s10 = sadd.s32 4294967295, %s1874_s21  ;;  %s1349_s13 = sshll.u32 %s279_s16, 4  ;;  %s1350_s13 = int_to_ptr.vmem [resolvable:$true] %s1349_s13 }
 0x313   : > { %p1340_p1 = scmp.gt.s32.totalorder %s1466_s10, 0  ;;  %s1332_s27 = scalar_lea.sflag [#allocation6], %s277_s30 }
 0x314   : > { %s1790_s12 = scalar_lea.vmem %s1350_s13, 128  ;;  %p2254_p8 = scmp.ne.s32.totalorder %s2246_s7, 0 }
 0x315   : > { %s2272_s10 = smov (!%p1340_p1, %s1466_s10), 0  ;;  %p1791_p7 = scmp.ne.s32.totalorder %s1350_s13, %s1790_s12 }
 0x316   : > { %s1345_s14 = sadd.s32 %s1878_s22, %s2272_s10  ;;  %s1907_s0 = smov [#allocation9]  }
 0x317   : > { %s1467_s11 = sshll.u32 %s1345_s14, 7  ;;  %p1792_p9 = pnand %p1791_p7, %p2254_p8 }
 0x318   : > { %s1347_s26 = scalar_lea.hbm %s2240_s5, %s1467_s11  ;;  %s1794_s21 = sshll.u32 %s1907_s0, 4  ;;  %s1795_s21 = int_to_ptr.vmem [resolvable:$false] %s1794_s21 }
 0x319   : > { %p1793_p13 = pneg %p1792_p9  ;;  %s1796_s6 = scalar_lea.vmem %s1795_s21, 256 }
 0x31a   : > { %p1797_p2 = scmp.lt.s32.totalorder %s1350_s13, %s1795_s21  ;;  %p1798_p3 = scmp.lt.s32.totalorder %s1796_s6, %s1790_s12 }
 0x31c   : > { %p1799_p4 = por %p1798_p3, %p1797_p2 }
 0x31e   : > { %p1800_p6 = pnand %p1799_p4, %p1793_p13 }
 0x320   : > { %1803 = shalt.err (!%p1800_p6)
}
 0x321   : > { %s1804_s22 = scalar_lea.hbm %s1347_s26, 128  ;;  %s1808_s10 = scalar_lea.hbm %s2240_s5, 256 }
 0x322   : > { %p1805_p5 = scmp.ne.s32.totalorder %s1347_s26, %s1804_s22  ;;  %p1809_p12 = scmp.lt.s32.totalorder %s1347_s26, %s2240_s5 }
 0x323   : > { %p1810_p0 = scmp.lt.s32.totalorder %s1808_s10, %s1804_s22 }
 0x324   : > { %p1806_p10 = pnand %p1805_p5, %p2254_p8 }
 0x325   : > { %p1811_p1 = por %p1810_p0, %p1809_p12 }
 0x326   : > { %p1807_p11 = pneg %p1806_p10 }
 0x328   : > { %p1812_p7 = pnand %p1811_p1, %p1807_p11 }
 0x32a   : > { %1815 = shalt.err (!%p1812_p7)
}
 0x32b   : > { %1634 = dma.vmem_to_hbm [thread:$0]  (%p2254_p8), %s1350_s13, 128, %s1347_s26, %s1332_s27  }
 0x32c PF: > { %p1651_p9 = scmp.ge.s32.totalorder %s1890_s25, 2  ;;  %s1361_s0 = sand.u32 1, %s1862_s18  }
 0x32d   : > { %p2255_p13 = scmp.ne.s32.totalorder %s2247_s9, 0  ;;  %s1362_s15 = scalar_lea.sflag [#allocation6], %s1361_s0 }
 0x32f   : > { %p1644_p2 = pnand %p1651_p9, %p2255_p13 }
 0x331   : > { %p1645_p3 = pneg %p1644_p2 }
 0x333   : > { %1857 = dma.done.wait (%p1645_p3), %s1362_s15, 128  }
 0x334   : > { %1859 = vsyncadd (%p1645_p3), %s1362_s15, 4294967168  ;;  %s20_s25 = sadd.s32 1, %s1890_s25   ;;  %s2256_s18 = smov %s1866_s19 }
 0x335   : > { %p17_p4 = scmp.ge.s32.totalorder %s20_s25, 6   ;;  %s2257_s19 = smov %s1870_s20 }
 0x336   : > { %s2258_s20 = smov %s2001_s8  ;;  %s2259_s21 = smov %s1882_s23 }
 0x337   : > { %s2260_s22 = smov %s1886_s24  ;;  %s2261_s23 = smov %s2264_s28 }
 0x338   : > { %s2262_s24 = smov %s2268_s29  ;;  %19 = sbr.rel (!%p17_p4) target bundleno = 9 (0x9), region = 92 }
 0x33d   :  { %1367 = vsyncpa [#allocation5], 1 }
 0x33e   :  { %1369 = vsyncpa [#allocation5 + $0x1], 1 }
 0x33f   :  { %1370 = vsyncpa [#allocation8], 1 }
 0x340   :  { %1371 = vsyncpa [#allocation6], 1 }
 0x341   :  { %1373 = vsyncpa [#allocation6 + $0x1], 1 }

</bundles_post_ra>
